<compile_context>
chip_gen: v7x
topology: tpu7x:2x2x1
jax: 0.10.0
libtpu: 0.0.40
codegen_flags: <defaults>
</compile_context>

<pallas_src>
import jax
import jax.numpy as jnp
from jax.experimental import pallas as pl
from jax.experimental.pallas import tpu as pltpu

BETA = 0.99
THRESHOLD = 0.5
SPIKE_SCALE = 5.0

_LANE_CANDIDATES = (1024, 512, 256, 128)


# ---------------------------------------------------------------------------
# Kernels
# ---------------------------------------------------------------------------
def _leaky_kernel(x_ref, mem_ref, spk_ref, mem_out_ref):
    # Elementwise hot path (VPU): decay + integrate, threshold, reset.
    m = mem_ref[...].astype(jnp.float32) * jnp.float32(BETA) + x_ref[...].astype(
        jnp.float32
    )
    fired = m >= jnp.float32(THRESHOLD)
    spk_ref[...] = jnp.where(
        fired, jnp.float32(SPIKE_SCALE), jnp.float32(0.0)
    ).astype(spk_ref.dtype)
    mem_out_ref[...] = jnp.where(fired, jnp.float32(0.0), m).astype(mem_out_ref.dtype)


def _leaky_scan_kernel(x_ref, mem_in_ref, spk_ref, mem_out_ref):
    # Grid = (row_blocks [parallel], T [arbitrary]).  mem_out block index is
    # independent of t, so it stays resident in VMEM across the whole time
    # loop (accumulator pattern): init at t==0, written back to HBM once per
    # row block.  Only x is streamed in and spk streamed out per step.
    @pl.when(pl.program_id(1) == 0)
    def _():
        mem_out_ref[...] = mem_in_ref[...]

    m = mem_out_ref[...].astype(jnp.float32) * jnp.float32(BETA) + x_ref[...].astype(
        jnp.float32
    )
    fired = m >= jnp.float32(THRESHOLD)
    spk_ref[...] = jnp.where(
        fired, jnp.float32(SPIKE_SCALE), jnp.float32(0.0)
    ).astype(spk_ref.dtype)
    mem_out_ref[...] = jnp.where(fired, jnp.float32(0.0), m).astype(mem_out_ref.dtype)


# ---------------------------------------------------------------------------
# Layout planning
# ---------------------------------------------------------------------------
def _pick_block_rows(rows, target_rows):
    if rows < 16:
        return rows  # single block == full row extent (always layout-legal)
    if rows <= target_rows:
        # Split into >=2 blocks so dimension_semantics=("parallel",) can shard
        # the work across both TensorCores on dual-TC chips (v7x); no-op cost
        # on single-TC v5e/v6e.
        return max(8, ((pl.cdiv(rows, 2) + 7) // 8) * 8)
    return target_rows


def _plan(total, target_block_elems, lane=None):
    """Pick (lane, rows, block_rows, padded_total) for a flat element count."""
    if lane is None:
        lane = next((c for c in _LANE_CANDIDATES if total % c == 0), 128)
    assert lane % 128 == 0
    padded_total = pl.cdiv(total, lane) * lane  # == total on the fast path
    rows = padded_total // lane
    target_rows = max(8, (max(target_block_elems, lane) // lane) // 8 * 8)
    block_rows = _pick_block_rows(rows, target_rows)
    return lane, rows, block_rows, padded_total


def _vmem_limit(block_bytes, n_resident_blocks):
    # actual double-buffered usage + a few MiB headroom, floor at the default.
    return int(min(100 << 20, max(32 << 20, n_resident_blocks * block_bytes + (8 << 20))))


# ---------------------------------------------------------------------------
# Single-step wrapper (EfficientLeaky.forward)
# ---------------------------------------------------------------------------
def efficient_leaky(x, mem, *, target_block_elems=1024 * 1024, lane=None):
    """Functional equivalent of EfficientLeaky.forward. Returns (spk, new_mem).

    x/mem are aliased into spk/new_mem; donate them (jit donate_argnums) for a
    true in-place membrane update.
    """
    assert x.shape == mem.shape, "x and mem must have identical shapes"
    orig_shape = x.shape
    dtype = x.dtype
    itemsize = jnp.dtype(dtype).itemsize
    total = x.size

    lane, rows, block_rows, padded_total = _plan(total, target_block_elems, lane)

    xf = x.reshape(-1)
    mf = mem.reshape(-1)
    if padded_total != total:
        # Rare fallback: element count has no 128-divisor; pad < lane elems.
        pad = padded_total - total
        xf = jnp.pad(xf, (0, pad))
        mf = jnp.pad(mf, (0, pad))  # padded mem=0, x=0 -> never fires; sliced off
    x2 = xf.reshape(rows, lane)
    m2 = mf.reshape(rows, lane)

    grid = (pl.cdiv(rows, block_rows),)  # ragged last block is masked by Pallas
    blk = pl.BlockSpec((block_rows, lane), lambda i: (i, 0))
    block_bytes = block_rows * lane * itemsize

    spk2, mem2 = pl.pallas_call(
        _leaky_kernel,
        out_shape=(
            jax.ShapeDtypeStruct((rows, lane), dtype),
            jax.ShapeDtypeStruct((rows, lane), dtype),
        ),
        grid_spec=pl.GridSpec(grid=grid, in_specs=[blk, blk], out_specs=(blk, blk)),
        # x fully consumed -> reuse its buffer for spk; mem updated in place.
        input_output_aliases={0: 0, 1: 1},
        compiler_params=pltpu.CompilerParams(
            dimension_semantics=("parallel",),
            vmem_limit_bytes=_vmem_limit(block_bytes, 4 * 2),
        ),
        cost_estimate=pl.CostEstimate(
            flops=5 * padded_total,
            transcendentals=0,
            bytes_accessed=4 * padded_total * itemsize,
        ),
    )(x2, m2)

    if padded_total != total:
        spk2 = spk2.reshape(-1)[:total]
        mem2 = mem2.reshape(-1)[:total]
    return spk2.reshape(orig_shape), mem2.reshape(orig_shape)


# ---------------------------------------------------------------------------
# Multi-step wrapper: T LIF steps with mem resident in VMEM (~2x less HBM)
# ---------------------------------------------------------------------------
def efficient_leaky_scan(xs, mem, *, target_block_elems=1024 * 1024, lane=None):
    """Apply the LIF step over xs[t] for t=0..T-1. Returns (spks, final_mem).

    xs: (T, *state_shape), mem: state_shape.  Equivalent to calling
    efficient_leaky in a Python loop, but mem never round-trips through HBM
    between steps.
    """
    T = xs.shape[0]
    assert xs.shape[1:] == mem.shape, "xs[t] and mem must have identical shapes"
    state_shape = mem.shape
    dtype = mem.dtype
    itemsize = jnp.dtype(dtype).itemsize
    total = mem.size

    lane, rows, block_rows, padded_total = _plan(total, target_block_elems, lane)

    xsf = xs.reshape(T, -1)
    mf = mem.reshape(-1)
    if padded_total != total:
        pad = padded_total - total
        xsf = jnp.pad(xsf, ((0, 0), (0, pad)))
        mf = jnp.pad(mf, (0, pad))
    x3 = xsf.reshape(T, rows, lane)
    m2 = mf.reshape(rows, lane)

    grid = (pl.cdiv(rows, block_rows), T)  # time axis last (reduction-like)
    x_spec = pl.BlockSpec((None, block_rows, lane), lambda i, t: (t, i, 0))
    mem_spec = pl.BlockSpec((block_rows, lane), lambda i, t: (i, 0))
    block_bytes = block_rows * lane * itemsize

    spk3, mem_out = pl.pallas_call(
        _leaky_scan_kernel,
        out_shape=(
            jax.ShapeDtypeStruct((T, rows, lane), dtype),
            jax.ShapeDtypeStruct((rows, lane), dtype),
        ),
        grid_spec=pl.GridSpec(
            grid=grid,
            in_specs=[x_spec, mem_spec],
            out_specs=(x_spec, mem_spec),
        ),
        input_output_aliases={1: 1},  # membrane state updated in place
        compiler_params=pltpu.CompilerParams(
            dimension_semantics=("parallel", "arbitrary"),
            vmem_limit_bytes=_vmem_limit(block_bytes, 4 * 2),
        ),
        cost_estimate=pl.CostEstimate(
            flops=5 * T * padded_total,
            transcendentals=0,
            bytes_accessed=(2 * T + 2) * padded_total * itemsize,
        ),
    )(x3, m2)

    if padded_total != total:
        spk3 = spk3.reshape(T, -1)[:, :total]
        mem_out = mem_out.reshape(-1)[:total]
    return spk3.reshape((T,) + state_shape), mem_out.reshape(state_shape)


# ---------------------------------------------------------------------------
# Pure-JAX references
# ---------------------------------------------------------------------------
def _reference(x, mem):
    m = mem.astype(jnp.float32) * BETA + x.astype(jnp.float32)
    fired = m >= THRESHOLD
    spk = jnp.where(fired, SPIKE_SCALE, 0.0).astype(x.dtype)
    m_new = jnp.where(fired, 0.0, m).astype(mem.dtype)
    return spk, m_new


def _reference_scan(xs, mem):
    spks = []
    m = mem
    for t in range(xs.shape[0]):
        s, m = _reference(xs[t], m)
        spks.append(s)
    return jnp.stack(spks, axis=0), m


if __name__ == "__main__":
    key = jax.random.PRNGKey(0)
    kx, km, kx2, km2, kx3, km3, kx4, km4 = jax.random.split(key, 8)

    leaky = jax.jit(efficient_leaky, static_argnames=("target_block_elems", "lane"))
    leaky_scan = jax.jit(
        efficient_leaky_scan, static_argnames=("target_block_elems", "lane")
    )

    # 1) Aligned NCHW-shaped state (lane=1024 fast path, no padding).
    x = jax.random.normal(kx, (2, 4, 16, 16), dtype=jnp.float32)
    mem = jax.random.uniform(km, (2, 4, 16, 16), dtype=jnp.float32)
    spk, new_mem = leaky(x, mem)
    jax.block_until_ready((spk, new_mem))
    spk_ref, mem_ref = _reference(x, mem)
    assert spk.shape == x.shape and new_mem.shape == mem.shape
    assert spk.dtype == x.dtype and new_mem.dtype == mem.dtype
    assert jnp.allclose(spk, spk_ref, atol=1e-6), "spike mismatch"
    assert jnp.allclose(new_mem, mem_ref, atol=1e-6), "membrane mismatch"

    # 2) Non-128-divisible size: pad fallback + ragged multi-block grid.
    x_b = jax.random.normal(kx2, (2, 4, 18, 18), dtype=jnp.float32)
    mem_b = jax.random.uniform(km2, (2, 4, 18, 18), dtype=jnp.float32)
    spk_b, mem_b_new = leaky(x_b, mem_b)
    jax.block_until_ready((spk_b, mem_b_new))
    spk_b_ref, mem_b_ref = _reference(x_b, mem_b)
    assert jnp.allclose(spk_b, spk_b_ref, atol=1e-6), "spike mismatch (padded)"
    assert jnp.allclose(mem_b_new, mem_b_ref, atol=1e-6), "membrane mismatch (padded)"

    # 3) Time-scan kernel (mem VMEM-resident across T), aligned shape.
    T = 6
    xs = jax.random.normal(kx3, (T, 2, 4, 16, 16), dtype=jnp.float32)
    mem_s = jax.random.uniform(km3, (2, 4, 16, 16), dtype=jnp.float32)
    spks, mem_final = leaky_scan(xs, mem_s)
    jax.block_until_ready((spks, mem_final))
    spks_ref, mem_final_ref = _reference_scan(xs, mem_s)
    assert spks.shape == xs.shape and mem_final.shape == mem_s.shape
    assert jnp.allclose(spks, spks_ref, atol=1e-5), "spike mismatch (scan)"
    assert jnp.allclose(mem_final, mem_final_ref, atol=1e-5), "membrane mismatch (scan)"

    # 4) Time-scan with forced lane=128: padded + ragged multi-block rows.
    T2 = 3
    xs2 = jax.random.normal(kx4, (T2, 2, 4, 18, 18), dtype=jnp.float32)
    mem_s2 = jax.random.uniform(km4, (2, 4, 18, 18), dtype=jnp.float32)
    spks2, mem_final2 = leaky_scan(xs2, mem_s2, lane=128)
    jax.block_until_ready((spks2, mem_final2))
    spks2_ref, mem_final2_ref = _reference_scan(xs2, mem_s2)
    assert jnp.allclose(spks2, spks2_ref, atol=1e-5), "spike mismatch (scan, padded)"
    assert jnp.allclose(
        mem_final2, mem_final2_ref, atol=1e-5
    ), "membrane mismatch (scan, padded)"

    print("KERNEL_OK")
</pallas_src>

<mosaic_0001>
module attributes {stable_mosaic.version = 11 : i64} {
  func.func @_leaky_kernel(%arg0: i32, %arg1: memref<2x1024xf32, #tpu.memory_space<vmem>>, %arg2: memref<2x1024xf32, #tpu.memory_space<vmem>>, %arg3: memref<2x1024xf32, #tpu.memory_space<vmem>>, %arg4: memref<2x1024xf32, #tpu.memory_space<vmem>>) attributes {dimension_semantics = [#tpu.dimension_semantics<parallel>], iteration_bounds = array<i64: 1>, scalar_prefetch = 0 : i64, scratch_operands = 0 : i64, tpu.core_type = #tpu.core_type<tc>, window_params = [{transform_indices = @transform_0, window_bounds = array<i64: 2, 1024>}, {transform_indices = @transform_1, window_bounds = array<i64: 2, 1024>}, {transform_indices = @transform_2, window_bounds = array<i64: 2, 1024>}, {transform_indices = @transform_3, window_bounds = array<i64: 2, 1024>}]} {
    %c0 = arith.constant 0 : index
    %c0_0 = arith.constant 0 : index
    %0 = vector.load %arg2[%c0, %c0_0] : memref<2x1024xf32, #tpu.memory_space<vmem>>, vector<2x1024xf32>
    %cst = arith.constant 9.900000e-01 : f32
    %1 = vector.broadcast %cst : f32 to vector<2x1024xf32>
    %2 = arith.mulf %0, %1 : vector<2x1024xf32>
    %c0_1 = arith.constant 0 : index
    %c0_2 = arith.constant 0 : index
    %3 = vector.load %arg1[%c0_1, %c0_2] : memref<2x1024xf32, #tpu.memory_space<vmem>>, vector<2x1024xf32>
    %4 = arith.addf %2, %3 : vector<2x1024xf32>
    %cst_3 = arith.constant 5.000000e-01 : f32
    %5 = vector.broadcast %cst_3 : f32 to vector<2x1024xf32>
    %6 = arith.cmpf oge, %4, %5 : vector<2x1024xf32>
    %cst_4 = arith.constant 5.000000e+00 : f32
    %cst_5 = arith.constant 0.000000e+00 : f32
    %7 = vector.broadcast %cst_4 : f32 to vector<2x1024xf32>
    %8 = vector.broadcast %cst_5 : f32 to vector<2x1024xf32>
    %9 = arith.select %6, %7, %8 : vector<2x1024xi1>, vector<2x1024xf32>
    %c0_6 = arith.constant 0 : index
    %c0_7 = arith.constant 0 : index
    %10 = vector.load %arg3[%c0_6, %c0_7] : memref<2x1024xf32, #tpu.memory_space<vmem>>, vector<2x1024xf32>
    tpu.vector_store %arg3[%c0_6, %c0_7], %9 {strides = array<i32>} : memref<2x1024xf32, #tpu.memory_space<vmem>>, vector<2x1024xf32>,
    %cst_8 = arith.constant 0.000000e+00 : f32
    %11 = vector.broadcast %cst_8 : f32 to vector<2x1024xf32>
    %12 = arith.select %6, %11, %4 : vector<2x1024xi1>, vector<2x1024xf32>
    %c0_9 = arith.constant 0 : index
    %c0_10 = arith.constant 0 : index
    %13 = vector.load %arg4[%c0_9, %c0_10] : memref<2x1024xf32, #tpu.memory_space<vmem>>, vector<2x1024xf32>
    tpu.vector_store %arg4[%c0_9, %c0_10], %12 {strides = array<i32>} : memref<2x1024xf32, #tpu.memory_space<vmem>>, vector<2x1024xf32>,
    return
  }
  func.func @transform_0(%arg0: i32) -> (i32, i32) {
    %c0_i32 = arith.constant 0 : i32
    %c0_i32_0 = arith.constant 0 : i32
    return %arg0, %c0_i32 : i32, i32
  }
  func.func @transform_1(%arg0: i32) -> (i32, i32) {
    %c0_i32 = arith.constant 0 : i32
    %c0_i32_0 = arith.constant 0 : i32
    return %arg0, %c0_i32 : i32, i32
  }
  func.func @transform_2(%arg0: i32) -> (i32, i32) {
    %c0_i32 = arith.constant 0 : i32
    %c0_i32_0 = arith.constant 0 : i32
    return %arg0, %c0_i32 : i32, i32
  }
  func.func @transform_3(%arg0: i32) -> (i32, i32) {
    %c0_i32 = arith.constant 0 : i32
    %c0_i32_0 = arith.constant 0 : i32
    return %arg0, %c0_i32 : i32, i32
  }
}

</mosaic_0001>

<bundles_post_ra>
// kernel: efficient_leaky.1
= control target key start
LH: loop header
LB: loop body
LE: loop exit
PB: predicated region body
PF: predicated region fallthrough
CT: control target
= control target key end

     0   :  { %v40_v8 = vmov 0.0   ;;  %s85_s0 = inlined_call_operand.vmem [shape: f32[2,1024], index: 0, kind: input, shape index: {}, may-alias: {0,2}]   ;;  %s86_s1 = inlined_call_operand.vmem [shape: f32[2,1024], index: 1, kind: input, shape index: {}, may-alias: {1,3}]   ;;  %s87_s2 = inlined_call_operand.vmem [shape: f32[2,1024], index: 2, kind: output, shape index: {0}, may-alias: {0,2}]   ;;  %s88_s3 = inlined_call_operand.vmem [shape: f32[2,1024], index: 3, kind: output, shape index: {1}, may-alias: {1,3}]  }
   0x1   :  { %v13_v0 = vld [vmem:[%s86_s1] sm:$0xff]  ;;  %v14_v2 = vld [vmem:[%s86_s1 + $0x8] sm:$0xff] }
   0x2   :  { %v17_v1 = vld [vmem:[%s85_s0] sm:$0xff]  ;;  %v15_v3 = vmul.f32 0.99, %v13_v0  ;;  %v16_v4 = vmul.f32 0.99, %v14_v2  ;;  %v18_v5 = vld [vmem:[%s85_s0 + $0x8] sm:$0xff] }
   0x4   :  { %v19_v6 = vadd.f32 %v17_v1, %v15_v3  ;;  %v20_v7 = vadd.f32 %v18_v5, %v16_v4 }
   0x6   :  { %vm21_vm0 = vcmp.ge.f32.partialorder %v19_v6, 0.5  ;;  %vm22_vm1 = vcmp.ge.f32.partialorder %v20_v7, 0.5 }
   0x7   :  { %v23_v9 = vsel %vm21_vm0, 5.0, %v40_v8  ;;  %v24_v10 = vsel %vm22_vm1, 5.0, %v40_v8  ;;  %v27_v11 = vsel %vm21_vm0, 0.0, %v19_v6  ;;  %v28_v12 = vsel %vm22_vm1, 0.0, %v20_v7 }
   0x8   :  { %25 = vst [vmem:[%s87_s2] sm:$0xff] %v23_v9  ;;  %26 = vst [vmem:[%s87_s2 + $0x8] sm:$0xff] %v24_v10 }
   0x9   :  { %29 = vst [vmem:[%s88_s3] sm:$0xff] %v27_v11  ;;  %30 = vst [vmem:[%s88_s3 + $0x8] sm:$0xff] %v28_v12 }

</bundles_post_ra>
